<compile_context>
chip_gen: v6e
topology: v6e:2x2x1
jax: 0.10.0
libtpu: 0.0.40
codegen_flags: <defaults>
</compile_context>

<pallas_src>
import jax
import jax.numpy as jnp
import numpy as np
from jax.experimental import pallas as pl
from jax.experimental.pallas import tpu as pltpu


def transition_kernel(x_ref, scale_ref, shift_ref, w_ref, pool_ref, o_ref):
    # x_ref     : (G*Cin,  N*HW )  channels in sublanes, batch*spatial in lanes
    # scale_ref : (G*Cin,  1    )  folded BN scale
    # shift_ref : (G*Cin,  1    )  folded BN shift
    # w_ref     : (G*Cout, G*Cin)  block-diagonal grouped 1x1 conv weight
    # pool_ref  : (N*HW,   N*HWp)  block-diagonal 2x2 average-pool matrix
    # o_ref     : (G*Cout, N*HWp)  output (lane-dense: N*HWp >= 128)

    # BatchNorm (inference, folded) + ReLU on the VPU, kept in f32.
    y = jnp.maximum(x_ref[...] * scale_ref[...] + shift_ref[...], 0.0)

    # Pool first (fewer MACs, smaller LHS for the second matmul) ...
    yp = jnp.dot(y, pool_ref[...], preferred_element_type=jnp.float32)   # (G*Cin, N*HWp)
    # ... then the grouped 1x1 conv as one block-diagonal matmul.
    z = jnp.dot(w_ref[...], yp, preferred_element_type=jnp.float32)      # (G*Cout, N*HWp)

    o_ref[...] = z.astype(o_ref.dtype)


def transition_forward(x_nchw, gamma, beta, run_mean, run_var, conv_w,
                       num_modules, eps=1e-5):
    """x_nchw: (N, G*Cin, H, W) f32.  conv_w: (G*Cout, Cin) (1x1 kernel squeezed)."""
    N, C, H, W = x_nchw.shape
    G = num_modules
    Cin = C // G
    Cout = conv_w.shape[0] // G
    HW = H * W
    Hp, Wp = H // 2, W // 2
    HWp = Hp * Wp

    # ---- JAX glue: fold BN, build block-diagonal weight & pool matrix ----
    scale = (gamma / jnp.sqrt(run_var + eps)).astype(jnp.float32)        # (C,)
    shift = (beta - run_mean * scale).astype(jnp.float32)                # (C,)
    scale = scale.reshape(C, 1)
    shift = shift.reshape(C, 1)

    # Block-diagonal grouped-conv weight: (G*Cout, G*Cin).
    w_g = conv_w.reshape(G, Cout, Cin).astype(jnp.float32)
    w_bd = jnp.zeros((G * Cout, G * Cin), dtype=jnp.float32)
    for g in range(G):
        w_bd = w_bd.at[g * Cout:(g + 1) * Cout,
                       g * Cin:(g + 1) * Cin].set(w_g[g])

    # 2x2 average-pool matrix (HW, HWp), replicated block-diagonally per batch.
    hh, ww = np.meshgrid(np.arange(H), np.arange(W), indexing="ij")
    p = (hh * W + ww).reshape(-1)
    pprime = ((hh // 2) * Wp + (ww // 2)).reshape(-1)
    pool_np = np.zeros((HW, HWp), dtype=np.float32)
    pool_np[p, pprime] = 0.25
    pool_bd = jnp.asarray(np.kron(np.eye(N, dtype=np.float32), pool_np))  # (N*HW, N*HWp)

    # Input layout: (N, C, H, W) -> (C, N*HW) so lanes hold batch*spatial.
    x_cl = jnp.transpose(x_nchw, (1, 0, 2, 3)).reshape(C, N * HW).astype(jnp.float32)

    # ---- Pallas call: single step, whole arrays resident in VMEM ---------
    vmem_spec = pl.BlockSpec(memory_space=pltpu.MemorySpace.VMEM)
    out = pl.pallas_call(
        transition_kernel,
        out_shape=jax.ShapeDtypeStruct((G * Cout, N * HWp), jnp.float32),
        in_specs=[vmem_spec] * 5,
        out_specs=vmem_spec,
    )(x_cl, scale, shift, w_bd, pool_bd)

    # (G*Cout, N*HWp) -> (N, G*Cout, Hp, Wp)
    out = out.reshape(G * Cout, N, Hp, Wp)
    return jnp.transpose(out, (1, 0, 2, 3))


def reference_forward(x, gamma, beta, run_mean, run_var, conv_w,
                      num_modules, eps=1e-5):
    """Plain-JAX reference matching the PyTorch forward (eval-mode BN)."""
    N, C, H, W = x.shape
    G = num_modules
    Cin = C // G
    Cout = conv_w.shape[0] // G
    xn = (x - run_mean[None, :, None, None]) / jnp.sqrt(
        run_var[None, :, None, None] + eps)
    xn = gamma[None, :, None, None] * xn + beta[None, :, None, None]
    xr = jnp.maximum(xn, 0.0)
    xg = xr.reshape(N, G, Cin, H * W)
    wg = conv_w.reshape(G, Cout, Cin)
    z = jnp.einsum("goc,ngcp->ngop", wg, xg).reshape(N, G * Cout, H, W)
    z = z.reshape(N, G * Cout, H // 2, 2, W // 2, 2).mean(axis=(3, 5))
    return z


if __name__ == "__main__":
    # Module hyper-params (small):
    n_channels = 4
    n_out_channels = 8
    num_modules = 2
    N, H, W = 2, 16, 16
    C_in = num_modules * n_channels          # 8
    C_out = num_modules * n_out_channels     # 16

    key = jax.random.PRNGKey(0)
    k_x, k_g, k_b, k_m, k_v, k_w = jax.random.split(key, 6)

    x = jax.random.normal(k_x, (N, C_in, H, W), dtype=jnp.float32)

    # Deterministic synthetic "parameters" (not a checkpoint load).
    gamma = jax.random.normal(k_g, (C_in,), dtype=jnp.float32) * 0.1 + 1.0
    beta = jax.random.normal(k_b, (C_in,), dtype=jnp.float32) * 0.1
    run_mean = jax.random.normal(k_m, (C_in,), dtype=jnp.float32) * 0.1
    run_var = jax.random.uniform(k_v, (C_in,), dtype=jnp.float32,
                                 minval=0.5, maxval=1.5)
    # Conv2d weight (G*Cout, Cin, 1, 1) with the 1x1 kernel dims squeezed.
    conv_w = jax.random.normal(k_w, (C_out, n_channels), dtype=jnp.float32) * 0.2

    out = transition_forward(x, gamma, beta, run_mean, run_var, conv_w,
                             num_modules)
    out = jax.block_until_ready(out)

    ref = reference_forward(x, gamma, beta, run_mean, run_var, conv_w,
                            num_modules)
    assert out.shape == (N, C_out, H // 2, W // 2), out.shape
    np.testing.assert_allclose(np.asarray(out), np.asarray(ref),
                               rtol=1e-4, atol=1e-4)
    print("KERNEL_OK")
</pallas_src>

<mosaic_0001>
module attributes {stable_mosaic.version = 11 : i64} {
  func.func @transition_kernel(%arg0: memref<8x512xf32, #tpu.memory_space<vmem>>, %arg1: memref<8x1xf32, #tpu.memory_space<vmem>>, %arg2: memref<8x1xf32, #tpu.memory_space<vmem>>, %arg3: memref<16x8xf32, #tpu.memory_space<vmem>>, %arg4: memref<512x128xf32, #tpu.memory_space<vmem>>, %arg5: memref<16x128xf32, #tpu.memory_space<vmem>>) attributes {dimension_semantics = [], scalar_prefetch = 0 : i64, scratch_operands = 0 : i64, tpu.core_type = #tpu.core_type<tc>} {
    %c0 = arith.constant 0 : index
    %c0_0 = arith.constant 0 : index
    %0 = vector.load %arg0[%c0, %c0_0] : memref<8x512xf32, #tpu.memory_space<vmem>>, vector<8x512xf32>
    %c0_1 = arith.constant 0 : index
    %c0_2 = arith.constant 0 : index
    %1 = vector.load %arg1[%c0_1, %c0_2] : memref<8x1xf32, #tpu.memory_space<vmem>>, vector<8x1xf32>
    %2 = vector.broadcast %1 : vector<8x1xf32> to vector<8x512xf32>
    %3 = arith.mulf %0, %2 : vector<8x512xf32>
    %c0_3 = arith.constant 0 : index
    %c0_4 = arith.constant 0 : index
    %4 = vector.load %arg2[%c0_3, %c0_4] : memref<8x1xf32, #tpu.memory_space<vmem>>, vector<8x1xf32>
    %5 = vector.broadcast %4 : vector<8x1xf32> to vector<8x512xf32>
    %6 = arith.addf %3, %5 : vector<8x512xf32>
    %cst = arith.constant 0.000000e+00 : f32
    %7 = vector.broadcast %cst : f32 to vector<8x512xf32>
    %8 = arith.maximumf %6, %7 : vector<8x512xf32>
    %c0_5 = arith.constant 0 : index
    %c0_6 = arith.constant 0 : index
    %9 = vector.load %arg4[%c0_5, %c0_6] : memref<512x128xf32, #tpu.memory_space<vmem>>, vector<512x128xf32>
    %cst_7 = arith.constant dense<0.000000e+00> : vector<8x128xf32>
    %10 = tpu.matmul %8, %9, %cst_7 {dimension_numbers = #tpu.dot_dimension_numbers<[1], [0], [0], [1], [0, 0, 1, 1], [], []>} : vector<8x512xf32>, vector<512x128xf32>, vector<8x128xf32> -> vector<8x128xf32>
    %c0_8 = arith.constant 0 : index
    %c0_9 = arith.constant 0 : index
    %11 = vector.load %arg3[%c0_8, %c0_9] : memref<16x8xf32, #tpu.memory_space<vmem>>, vector<16x8xf32>
    %cst_10 = arith.constant dense<0.000000e+00> : vector<16x128xf32>
    %12 = tpu.matmul %11, %10, %cst_10 {dimension_numbers = #tpu.dot_dimension_numbers<[1], [0], [0], [1], [0, 0, 1, 1], [], []>} : vector<16x8xf32>, vector<8x128xf32>, vector<16x128xf32> -> vector<16x128xf32>
    %c0_11 = arith.constant 0 : index
    %c0_12 = arith.constant 0 : index
    %13 = vector.load %arg5[%c0_11, %c0_12] : memref<16x128xf32, #tpu.memory_space<vmem>>, vector<16x128xf32>
    tpu.vector_store %arg5[%c0_11, %c0_12], %12 {strides = array<i32>} : memref<16x128xf32, #tpu.memory_space<vmem>>, vector<16x128xf32>,
    return
  }
}

</mosaic_0001>

<bundles_post_ra>
// kernel: tpu_custom_call.1
= control target key start
LH: loop header
LB: loop body
LE: loop exit
PB: predicated region body
PF: predicated region fallthrough
CT: control target
= control target key end

     0   :  { %10 = vsyncpa [#allocation3], 0  ;;  %s571_s0 = inlined_call_operand.vmem [shape: f32[8,512], index: 0, kind: input, shape index: {}]   ;;  %s572_s1 = inlined_call_operand.vmem [shape: f32[8,1], index: 1, kind: input, shape index: {}]   ;;  %s573_s2 = inlined_call_operand.vmem [shape: f32[8,1], index: 2, kind: input, shape index: {}]   ;;  %s574_s3 = inlined_call_operand.vmem [shape: f32[16,8], index: 3, kind: input, shape index: {}]   ;;  %s575_s4 = inlined_call_operand.hbm [shape: f32[512,128], index: 4, kind: input, shape index: {}]   ;;  %s576_s5 = inlined_call_operand.hbm [shape: f32[16,128], index: 5, kind: output, shape index: {}]  }
   0x1   :  { %11 = vsyncpa [#allocation4], 0  ;;  %s500_s18 = smov [#allocation2]  }
   0x2   :  { %s25_s19 = sshll.u32 %s500_s18, 4  ;;  %s26_s19 = int_to_ptr.vmem [resolvable:$true] %s25_s19 }
   0x3   :  { %s464_s20 = scalar_lea.vmem %s26_s19, 8192  ;;  %p469_p1 = scmp.lt.s32.totalorder %s26_s19, %s26_s19 }
   0x4   :  { %p465_p0 = scmp.ne.s32.totalorder %s26_s19, %s464_s20  ;;  %p470_p2 = scmp.lt.s32.totalorder %s464_s20, %s464_s20 }
   0x6   :  { %p471_p3 = por %p470_p2, %p469_p1 }
   0x8   :  { %p472_p4 = pnand %p471_p3, %p465_p0 }
   0xa   :  { %475 = shalt.err (!%p472_p4)
}
   0xb   :  { %s501_s21 = smov 128   ;;  %s502_s22 = smov 8  }
   0xc   :  { %31 = dma.hbm_to_vmem [thread:$0]  %s575_s4, 8192, %s26_s19, [#allocation3], %s501_s21, %s501_s21, %s502_s22  }
   0xd   :  { %496 = dma.done.wait [#allocation3], 8192  }
   0xe   :  { %497 = vsyncadd [#allocation3], 4294959104  ;;  %v503_v0 = vmov 0   ;;  %v39_v1 = vld [vmem:[%s572_s1] sm:$0xff]  ;;  %v94_v3 = vld [vmem:[#allocation2 + $0xf8] sm:$0xff]  ;;  %vm269_vm0 = vcmask 64512  }
   0xf   :  { %455 = vset.pattern.permute.xlu0 %v503_v0  ;;  %v49_v2 = vld [vmem:[%s573_s2] sm:$0xff]  ;;  %372 = vmatprep.subr.mxu0 %v94_v3  ;;  %v126_v4 = vld [vmem:[#allocation2 + $0x1f8] sm:$0xff]  ;;  %v93_v7 = vld [vmem:[#allocation2 + $0xf0] sm:$0xff]  ;;  %s504_s12 = smov [#allocation5]  }
  0x10   :  { %42 = vperm.xlu0 %455, %v39_v1   ;;  %v78_v5 = vld [vmem:[#allocation2 + $0x78] sm:$0xff]  ;;  %407 = vmatprep.subr.mxu1 %v126_v4  ;;  %v125_v8 = vld [vmem:[#allocation2 + $0x1f0] sm:$0xff]  ;;  %v92_v11 = vld [vmem:[#allocation2 + $0xe8] sm:$0xff]  ;;  %s358_s13 = sshll.u32 %s504_s12, 4  ;;  %s359_s13 = int_to_ptr.vmem [resolvable:$true] %s358_s13 }
  0x11   :  { %v110_v6 = vld [vmem:[#allocation2 + $0x178] sm:$0xff]  ;;  %373 = vmatpush3.msra.mxu0 %v78_v5  ;;  %v77_v9 = vld [vmem:[#allocation2 + $0x70] sm:$0xff]  ;;  %v124_v12 = vld [vmem:[#allocation2 + $0x1e8] sm:$0xff]  ;;  %s476_s14 = scalar_lea.vmem %s359_s13, 256  ;;  %p481_p6 = scmp.lt.s32.totalorder %s359_s13, %s359_s13 }
  0x12   :  { %408 = vmatpush3.msra.mxu1 %v110_v6  ;;  %374 = vmatprep.subr.mxu0 %v93_v7  ;;  %v109_v10 = vld [vmem:[#allocation2 + $0x170] sm:$0xff]  ;;  %v76_v13 = vld [vmem:[#allocation2 + $0x68] sm:$0xff]  ;;  %v91_v15 = vld [vmem:[#allocation2 + $0xe0] sm:$0xff]  ;;  %p477_p5 = scmp.ne.s32.totalorder %s359_s13, %s476_s14  ;;  %p482_p7 = scmp.lt.s32.totalorder %s476_s14, %s476_s14 }
  0x13   :  { %409 = vmatprep.subr.mxu1 %v125_v8  ;;  %375 = vmatpush3.msra.mxu0 %v77_v9  ;;  %v108_v14 = vld [vmem:[#allocation2 + $0x168] sm:$0xff]  ;;  %v123_v16 = vld [vmem:[#allocation2 + $0x1e0] sm:$0xff]  ;;  %v90_v19 = vld [vmem:[#allocation2 + $0xd8] sm:$0xff] }
  0x14   :  { %52 = vperm.xlu0 %455, %v49_v2   ;;  %410 = vmatpush3.msra.mxu1 %v109_v10  ;;  %v75_v17 = vld [vmem:[#allocation2 + $0x60] sm:$0xff]  ;;  %v122_v20 = vld [vmem:[#allocation2 + $0x1d8] sm:$0xff]  ;;  %v89_v23 = vld [vmem:[#allocation2 + $0xd0] sm:$0xff]  ;;  %p483_p8 = por %p482_p7, %p481_p6 }
  0x15   :  { %376 = vmatprep.subr.mxu0 %v92_v11  ;;  %411 = vmatprep.subr.mxu1 %v124_v12  ;;  %v107_v18 = vld [vmem:[#allocation2 + $0x160] sm:$0xff]  ;;  %v74_v21 = vld [vmem:[#allocation2 + $0x58] sm:$0xff]  ;;  %v121_v24 = vld [vmem:[#allocation2 + $0x1d0] sm:$0xff] }
  0x16   :  { %377 = vmatpush3.msra.mxu0 %v76_v13  ;;  %412 = vmatpush3.msra.mxu1 %v108_v14  ;;  %v106_v22 = vld [vmem:[#allocation2 + $0x158] sm:$0xff]  ;;  %v73_v25 = vld [vmem:[#allocation2 + $0x50] sm:$0xff]  ;;  %v88_v27 = vld [vmem:[#allocation2 + $0xc8] sm:$0xff]  ;;  %p484_p9 = pnand %p483_p8, %p477_p5 }
  0x17   :  { %378 = vmatprep.subr.mxu0 %v91_v15  ;;  %413 = vmatprep.subr.mxu1 %v123_v16  ;;  %v105_v26 = vld [vmem:[#allocation2 + $0x150] sm:$0xff]  ;;  %v120_v28 = vld [vmem:[#allocation2 + $0x1c8] sm:$0xff]  ;;  %v87_v31 = vld [vmem:[#allocation2 + $0xc0] sm:$0xff] }
  0x18   :  { %379 = vmatpush3.msra.mxu0 %v75_v17  ;;  %414 = vmatpush3.msra.mxu1 %v107_v18  ;;  %v72_v29 = vld [vmem:[#allocation2 + $0x48] sm:$0xff]  ;;  %v119_v32 = vld [vmem:[#allocation2 + $0x1c0] sm:$0xff]  ;;  %v86_v35 = vld [vmem:[#allocation2 + $0xb8] sm:$0xff] }
  0x19   :  { %380 = vmatprep.subr.mxu0 %v90_v19  ;;  %415 = vmatprep.subr.mxu1 %v122_v20  ;;  %v104_v30 = vld [vmem:[#allocation2 + $0x148] sm:$0xff]  ;;  %v71_v33 = vld [vmem:[#allocation2 + $0x40] sm:$0xff]  ;;  %v118_v36 = vld [vmem:[#allocation2 + $0x1b8] sm:$0xff] }
  0x1a   :  { %381 = vmatpush3.msra.mxu0 %v74_v21  ;;  %416 = vmatpush3.msra.mxu1 %v106_v22  ;;  %v103_v34 = vld [vmem:[#allocation2 + $0x140] sm:$0xff]  ;;  %v70_v37 = vld [vmem:[#allocation2 + $0x38] sm:$0xff]  ;;  %v85_v39 = vld [vmem:[#allocation2 + $0xb0] sm:$0xff] }
  0x1b   :  { %382 = vmatprep.subr.mxu0 %v89_v23  ;;  %417 = vmatprep.subr.mxu1 %v121_v24  ;;  %v102_v38 = vld [vmem:[#allocation2 + $0x138] sm:$0xff]  ;;  %v117_v40 = vld [vmem:[#allocation2 + $0x1b0] sm:$0xff]  ;;  %v84_v43 = vld [vmem:[#allocation2 + $0xa8] sm:$0xff] }
  0x1c   :  { %383 = vmatpush3.msra.mxu0 %v73_v25  ;;  %418 = vmatpush3.msra.mxu1 %v105_v26  ;;  %v69_v41 = vld [vmem:[#allocation2 + $0x30] sm:$0xff]  ;;  %v116_v44 = vld [vmem:[#allocation2 + $0x1a8] sm:$0xff]  ;;  %v83_v47 = vld [vmem:[#allocation2 + $0xa0] sm:$0xff] }
  0x1d   :  { %384 = vmatprep.subr.mxu0 %v88_v27  ;;  %419 = vmatprep.subr.mxu1 %v120_v28  ;;  %v101_v42 = vld [vmem:[#allocation2 + $0x130] sm:$0xff]  ;;  %v68_v45 = vld [vmem:[#allocation2 + $0x28] sm:$0xff]  ;;  %v115_v48 = vld [vmem:[#allocation2 + $0x1a0] sm:$0xff] }
  0x1e   :  { %385 = vmatpush3.msra.mxu0 %v72_v29  ;;  %420 = vmatpush3.msra.mxu1 %v104_v30  ;;  %v100_v46 = vld [vmem:[#allocation2 + $0x128] sm:$0xff]  ;;  %v67_v49 = vld [vmem:[#allocation2 + $0x20] sm:$0xff]  ;;  %v82_v51 = vld [vmem:[#allocation2 + $0x98] sm:$0xff] }
  0x1f   :  { %386 = vmatprep.subr.mxu0 %v87_v31  ;;  %421 = vmatprep.subr.mxu1 %v119_v32  ;;  %v99_v50 = vld [vmem:[#allocation2 + $0x120] sm:$0xff]  ;;  %v114_v52 = vld [vmem:[#allocation2 + $0x198] sm:$0xff]  ;;  %v81_v55 = vld [vmem:[#allocation2 + $0x90] sm:$0xff] }
  0x20   :  { %387 = vmatpush3.msra.mxu0 %v71_v33  ;;  %422 = vmatpush3.msra.mxu1 %v103_v34  ;;  %v66_v53 = vld [vmem:[#allocation2 + $0x18] sm:$0xff]  ;;  %v113_v56 = vld [vmem:[#allocation2 + $0x190] sm:$0xff]  ;;  %v80_v59 = vld [vmem:[#allocation2 + $0x88] sm:$0xff] }
  0x21   :  { %388 = vmatprep.subr.mxu0 %v86_v35  ;;  %423 = vmatprep.subr.mxu1 %v118_v36  ;;  %v98_v54 = vld [vmem:[#allocation2 + $0x118] sm:$0xff]  ;;  %v65_v57 = vld [vmem:[#allocation2 + $0x10] sm:$0xff]  ;;  %v112_v60 = vld [vmem:[#allocation2 + $0x188] sm:$0xff] }
  0x22   :  { %389 = vmatpush3.msra.mxu0 %v70_v37  ;;  %424 = vmatpush3.msra.mxu1 %v102_v38  ;;  %v97_v58 = vld [vmem:[#allocation2 + $0x110] sm:$0xff]  ;;  %v64_v61 = vld [vmem:[#allocation2 + $0x8] sm:$0xff]  ;;  %v79_v63 = vld [vmem:[#allocation2 + $0x80] sm:$0xff] }
  0x23   :  { %390 = vmatprep.subr.mxu0 %v85_v39  ;;  %425 = vmatprep.subr.mxu1 %v117_v40  ;;  %v96_v62 = vld [vmem:[#allocation2 + $0x108] sm:$0xff]  ;;  %v111_v0 = vld [vmem:[#allocation2 + $0x180] sm:$0xff]  ;;  %v37_v5 = vld [vmem:[%s571_s0 + $0x10] sm:$0xff] }
  0x24   :  { %391 = vmatpush3.msra.mxu0 %v69_v41  ;;  %426 = vmatpush3.msra.mxu1 %v101_v42  ;;  %v63_v1 = vld [vmem:[#allocation2] sm:$0xff]  ;;  %v36_v6 = vld [vmem:[%s571_s0 + $0x8] sm:$0xff]  ;;  %v38_v7 = vld [vmem:[%s571_s0 + $0x18] sm:$0xff] }
  0x25   :  { %392 = vmatprep.subr.mxu0 %v84_v43  ;;  %427 = vmatprep.subr.mxu1 %v116_v44  ;;  %v95_v2 = vld [vmem:[#allocation2 + $0x100] sm:$0xff]  ;;  %v268_v29 = vld [vmem:[%s574_s3 + $0x8] sm:$0xff] }
  0x26   :  { %393 = vmatpush3.msra.mxu0 %v68_v45  ;;  %428 = vmatpush3.msra.mxu1 %v100_v46  ;;  %v35_v3 = vld [vmem:[%s571_s0] sm:$0xff] }
  0x27   :  { %394 = vmatprep.subr.mxu0 %v83_v47  ;;  %429 = vmatprep.subr.mxu1 %v115_v48  ;;  %v267_v21 = vld [vmem:[%s574_s3] sm:$0xff] }
  0x28   :  { %395 = vmatpush3.msra.mxu0 %v67_v49  ;;  %430 = vmatpush3.msra.mxu1 %v99_v50 }
  0x29   :  { %396 = vmatprep.subr.mxu0 %v82_v51  ;;  %431 = vmatprep.subr.mxu1 %v114_v52 }
  0x2a   :  { %397 = vmatpush3.msra.mxu0 %v66_v53  ;;  %432 = vmatpush3.msra.mxu1 %v98_v54 }
  0x2b   :  { %398 = vmatprep.subr.mxu0 %v81_v55  ;;  %433 = vmatprep.subr.mxu1 %v113_v56 }
  0x2c   :  { %399 = vmatpush3.msra.mxu0 %v65_v57  ;;  %434 = vmatpush3.msra.mxu1 %v97_v58 }
  0x2d   :  { %400 = vmatprep.subr.mxu0 %v80_v59  ;;  %435 = vmatprep.subr.mxu1 %v112_v60 }
  0x2e   :  { %401 = vmatpush3.msra.mxu0 %v64_v61  ;;  %436 = vmatpush3.msra.mxu1 %v96_v62 }
  0x2f   :  { %402 = vmatprep.subr.mxu0 %v79_v63  ;;  %437 = vmatprep.subr.mxu1 %v111_v0 }
  0x30   :  { %403 = vmatpush3.msra.mxu0 %v63_v1  ;;  %438 = vmatpush3.msra.mxu1 %v95_v2 }
  0x8b   :  { %v43_v4 = vpop.permute.xlu0 %42 }
  0x8c   :  { %v45_v8 = vmul.f32 %v43_v4, %v35_v3  ;;  %v47_v9 = vmul.f32 %v43_v4, %v37_v5  ;;  %v46_v10 = vmul.f32 %v43_v4, %v36_v6  ;;  %v48_v11 = vmul.f32 %v43_v4, %v38_v7 }
  0x8f   :  { %v53_v12 = vpop.permute.xlu0 %52 }
  0x90   :  { %v55_v13 = vadd.f32 %v53_v12, %v45_v8  ;;  %v57_v14 = vadd.f32 %v53_v12, %v47_v9  ;;  %v56_v15 = vadd.f32 %v53_v12, %v46_v10  ;;  %v58_v16 = vadd.f32 %v53_v12, %v48_v11 }
  0x92   :  { %v60_v17 = vmax.f32 %v56_v15, 0.0  ;;  %v62_v18 = vmax.f32 %v58_v16, 0.0  ;;  %v59_v19 = vmax.f32 %v55_v13, 0.0  ;;  %v61_v20 = vmax.f32 %v57_v14, 0.0 }
  0x94   :  { %191 = vmatprep.mubr.f32.mxu0 %v60_v17  ;;  %261 = vmatprep.mubr.f32.mxu1 %v62_v18 }
  0x95   :  { %192 = vmatmul.mubr.f32.vlgmr.msra.gmra.mxu0 %v59_v19  ;;  %262 = vmatmul.mubr.f32.vlgmr.msra.gmra.mxu1 %v61_v20 }
  0x96   :  { %447 = vmatprep.mubr.msk.f32.mxu0 %vm269_vm0, %v267_v21 }
 0x155   :  { %v404_v22 = vpop.f32.mrf.mxu0  ;;  %v439_v23 = vpop.f32.mrf.mxu1 }
 0x157   :  { %v405_v24 = vpop.f32.mrf.mxu0  ;;  %v440_v25 = vpop.f32.mrf.mxu1 }
 0x158   :  { %v406_v26 = vadd.f32 %v405_v24, %v404_v22  ;;  %v441_v27 = vadd.f32 %v440_v25, %v439_v23 }
 0x15a   :  { %v264_v28 = vadd.f32 %v441_v27, %v406_v26 }
 0x15c   :  { %445 = vmatprep.subr.mxu0 %v264_v28 }
 0x15d   :  { %446 = vmatpush3.msra.mxu0 %v264_v28 }
 0x15e   :  { %448 = vmatmul.mubr.msk.f32.vlgmr.msra.gmra.mxu0 %vm269_vm0, %v268_v29 }
 0x21e   :  { %v449_v30 = vpop.f32.mrf.mxu0 }
 0x21f   :  { %352 = vst [vmem:[#allocation5 + $0x8] sm:$0xff] %v449_v30 }
 0x220   :  { %v342_v31 = vpop.f32.mrf.mxu0 }
 0x221   :  { %351 = vst [vmem:[#allocation5] sm:$0xff] %v342_v31 }
 0x222   :  { %487 = shalt.err (!%p484_p9)
}
 0x223   :  { %364 = dma.vmem_to_hbm [thread:$0]  %s359_s13, 256, %s576_s5, [#allocation4], %s501_s21, %s501_s21, %s502_s22  }
 0x224   :  { %498 = dma.done.wait [#allocation4], 256  }
 0x225   :  { %499 = vsyncadd [#allocation4], 4294967040 }
 0x226   :  { %368 = vsyncpa [#allocation3], 1 }
 0x227   :  { %369 = vsyncpa [#allocation4], 1 }

</bundles_post_ra>
